<compile_context>
chip_gen: v5e
topology: v5e:2x2
jax: 0.10.0
libtpu: 0.0.40
codegen_flags: <defaults>
</compile_context>

<pallas_src>
import functools
import math

import jax
import jax.numpy as jnp
import numpy as np
from jax.experimental import pallas as pl
from jax.experimental.pallas import tpu as pltpu


def _attention_layer_kernel(q_ref, k_ref, v_ref,
                            wq_ref, bq_ref, wk_ref, bk_ref,
                            wv_ref, bv_ref, wo_ref, bo_ref,
                            out_ref, *rest,
                            n_heads, d_k, d_v, scale, compute_dtype,
                            output_attention):
    if output_attention:
        attn_ref, qh_s, kh_s, vh_s, ctx_s = rest
    else:
        attn_ref = None
        qh_s, kh_s, vh_s, ctx_s = rest

    H, dk, dv = n_heads, d_k, d_v
    cdt = compute_dtype

    # --- K/V projections: full-width MXU matmuls, computed once per batch element.
    # Correctness invariant: the query-tile axis (grid axis 1) must stay sequential
    # ('arbitrary') so i == 0 is visited first for every b and the persistent
    # head-major scratch is valid for the remaining tiles of that batch element. ---
    @pl.when(pl.program_id(1) == 0)
    def _():
        xk = k_ref[0].astype(cdt)                                           # (S, D)
        xv = v_ref[0].astype(cdt)
        k = (jnp.dot(xk, wk_ref[...], preferred_element_type=jnp.float32)
             + bk_ref[...]).astype(cdt)                                     # (S, H*dk)
        v = (jnp.dot(xv, wv_ref[...], preferred_element_type=jnp.float32)
             + bv_ref[...]).astype(cdt)                                     # (S, H*dv)
        # Head split: static lane-slice stores into head-major bf16 scratch so every
        # attention matmul below is a single batched dot_general.
        for h in range(H):
            kh_s[h] = k[:, h * dk:(h + 1) * dk]
            vh_s[h] = v[:, h * dv:(h + 1) * dv]

    # --- Q projection for this query tile (f32 accumulate, scale folded into Q). ---
    xq = q_ref[0].astype(cdt)                                               # (tq, D)
    q = jnp.dot(xq, wq_ref[...], preferred_element_type=jnp.float32) + bq_ref[...]
    q = (q * scale).astype(cdt)                                             # (tq, H*dk)
    for h in range(H):
        qh_s[h] = q[:, h * dk:(h + 1) * dk]

    qh = qh_s[...]                                                          # (H, tq, dk) bf16
    kh = kh_s[...]                                                          # (H, S,  dk) bf16
    vh = vh_s[...]                                                          # (H, S,  dv) bf16

    # --- Scores for all heads: one batched MXU pass, no transpose, no per-head loop. ---
    s = jnp.einsum('hqe,hke->hqk', qh, kh,
                   preferred_element_type=jnp.float32)                      # (H, tq, S)

    # Numerically-stable softmax pieces (f32); normalize via EUP approx reciprocal.
    m = jnp.max(s, axis=-1, keepdims=True)
    p = jnp.exp(s - m)
    denom = jnp.sum(p, axis=-1, keepdims=True)
    inv = pl.reciprocal(denom, approx=True)                                 # (H, tq, 1)

    if output_attention:
        a = p * inv                                                         # (H, tq, S)
        attn_ref[0] = a.astype(attn_ref.dtype)
        ctx = jnp.einsum('hqk,hkv->hqv', a.astype(cdt), vh,
                         preferred_element_type=jnp.float32)                # (H, tq, dv)
    else:
        # Skip materializing `a`: run A@V on unnormalized p and rescale the (much
        # smaller) ctx by the reciprocal afterwards.
        ctx = jnp.einsum('hqk,hkv->hqv', p.astype(cdt), vh,
                         preferred_element_type=jnp.float32)                # (H, tq, dv)
        ctx = ctx * inv

    # --- Output projection: pack ctx heads into a lane-dense (tq, H*dv) bf16 scratch
    #     and do one flat matmul against the unsplit wo (contraction depth = d_model;
    #     head-sum is free inside the MXU accumulation). ---
    ctx_b = ctx.astype(cdt)
    for h in range(H):
        ctx_s[:, h * dv:(h + 1) * dv] = ctx_b[h]

    out = jnp.dot(ctx_s[...], wo_ref[...],
                  preferred_element_type=jnp.float32) + bo_ref[...]         # (tq, D)
    out_ref[0] = out.astype(out_ref.dtype)


def _padded_bytes(shape, dtype):
    """Bytes of a VMEM tile after (sublane, lane) padding."""
    itemsize = jnp.dtype(dtype).itemsize
    s = list(shape)
    if len(s) >= 1:
        s[-1] = -(-s[-1] // 128) * 128
    if len(s) >= 2:
        sub = 8 * max(1, 4 // itemsize)
        s[-2] = -(-s[-2] // sub) * sub
    n = 1
    for d in s:
        n *= d
    return n * itemsize


def attention_layer(queries, keys, values, attn_mask, params, n_heads,
                    *, output_attention=True, compute_dtype=jnp.bfloat16,
                    attn_dtype=jnp.bfloat16):
    """Pallas implementation of Informer AttentionLayer.forward (FullAttention,
    mask_flag=False, mix=False).  Returns (out, attn); attn is None when
    output_attention=False."""
    del attn_mask  # mask_flag=False: attention mask unused
    B, L, D = queries.shape
    _, S, _ = keys.shape
    wq, bq, wk, bk, wv, bv, wo, bo = params
    HK = wq.shape[1]                    # n_heads * d_k
    HV = wv.shape[1]                    # n_heads * d_v
    d_k = HK // n_heads
    d_v = HV // n_heads

    # MXU operand dtype: cast weights once here; biases stay f32 (added to f32 accums).
    wq_c = wq.astype(compute_dtype)
    wk_c = wk.astype(compute_dtype)
    wv_c = wv.astype(compute_dtype)
    wo_c = wo.astype(compute_dtype)     # kept flat: (H*d_v, D)

    # --- VMEM budget (generation-aware) and query-tile selection. ---
    try:
        phys_vmem = int(pltpu.get_tpu_info().vmem_capacity_bytes)
    except Exception:
        phys_vmem = 64 * 1024 * 1024    # conservative (v7x per-TC)
    budget = int(phys_vmem * 0.80)      # headroom for compiler-internal temporaries

    cdt = compute_dtype
    in_dt = queries.dtype

    def est_bytes(tq):
        # Double-buffered grid-varying blocks.
        io = 2 * (_padded_bytes((tq, D), in_dt)            # q tile
                  + _padded_bytes((S, D), in_dt)           # k
                  + _padded_bytes((S, D), in_dt)           # v
                  + _padded_bytes((tq, D), in_dt))         # out tile
        if output_attention:
            io += 2 * n_heads * _padded_bytes((tq, S), attn_dtype)
        # Weights / biases (grid-invariant, still double-buffered by default).
        w = (_padded_bytes((D, HK), cdt) * 2
             + _padded_bytes((D, HV), cdt)
             + _padded_bytes((HV, D), cdt)
             + _padded_bytes((1, HK), jnp.float32) * 2
             + _padded_bytes((1, HV), jnp.float32)
             + _padded_bytes((1, D), jnp.float32))
        io += 2 * w
        # Persistent scratch (bf16, padded per head slab).
        sc = (n_heads * _padded_bytes((tq, d_k), cdt)
              + n_heads * _padded_bytes((S, d_k), cdt)
              + n_heads * _padded_bytes((S, d_v), cdt)
              + _padded_bytes((tq, HV), cdt))
        # In-kernel f32 temporaries: scores + probs (+ normalized a), ctx, projections.
        n_big = 3 if output_attention else 2
        tmp = (n_big * n_heads * _padded_bytes((tq, S), jnp.float32)
               + n_heads * _padded_bytes((tq, d_v), jnp.float32)
               + _padded_bytes((tq, HK), jnp.float32)
               + _padded_bytes((S, HK), jnp.float32)
               + _padded_bytes((S, HV), jnp.float32))
        return io + sc + tmp

    def choose_q_tile():
        cands = [L]
        if L % 8 == 0:
            for t in (1024, 512, 256, 128, 64, 32, 16, 8):
                if t < L and L % t == 0:
                    cands.append(t)
        for t in cands:                 # largest first
            if est_bytes(t) <= budget:
                return t
        return cands[-1]

    tq = choose_q_tile()
    n_q = L // tq
    grid = (B, n_q)

    est = est_bytes(tq)
    vmem_limit = int(min(int(phys_vmem * 0.95),
                         max(32 * 1024 * 1024, int(est * 1.3))))

    kernel = functools.partial(
        _attention_layer_kernel,
        n_heads=n_heads, d_k=d_k, d_v=d_v, scale=1.0 / math.sqrt(d_k),
        compute_dtype=compute_dtype, output_attention=output_attention)

    const2 = lambda shape: pl.BlockSpec(shape, lambda b, i: (0, 0))

    in_specs = [
        pl.BlockSpec((1, tq, D), lambda b, i: (b, i, 0)),   # queries (tiled over L)
        pl.BlockSpec((1, S, D), lambda b, i: (b, 0, 0)),    # keys   (per batch)
        pl.BlockSpec((1, S, D), lambda b, i: (b, 0, 0)),    # values (per batch)
        const2((D, HK)), const2((1, HK)),                   # Wq, bq
        const2((D, HK)), const2((1, HK)),                   # Wk, bk
        const2((D, HV)), const2((1, HV)),                   # Wv, bv
        const2((HV, D)), const2((1, D)),                    # Wo (flat), bo
    ]

    out_shapes = [jax.ShapeDtypeStruct((B, L, D), queries.dtype)]
    out_specs = [pl.BlockSpec((1, tq, D), lambda b, i: (b, i, 0))]
    if output_attention:
        # TODO(synk): if S is not a multiple of 128 this writeback uses masked partial
        # stores; a lane-padded attn layout would be faster but changes the output shape.
        out_shapes.append(jax.ShapeDtypeStruct((B, n_heads, L, S), attn_dtype))
        out_specs.append(pl.BlockSpec((1, n_heads, tq, S), lambda b, i: (b, 0, i, 0)))

    scratch_shapes = [
        pltpu.VMEM((n_heads, tq, d_k), compute_dtype),   # head-major Q tile
        pltpu.VMEM((n_heads, S, d_k), compute_dtype),    # head-major K (per batch)
        pltpu.VMEM((n_heads, S, d_v), compute_dtype),    # head-major V (per batch)
        pltpu.VMEM((tq, HV), compute_dtype),             # lane-dense ctx for out-proj
    ]

    res = pl.pallas_call(
        kernel,
        out_shape=tuple(out_shapes),
        grid_spec=pltpu.PrefetchScalarGridSpec(
            num_scalar_prefetch=0,
            grid=grid,
            in_specs=in_specs,
            out_specs=out_specs,
            scratch_shapes=scratch_shapes),
        compiler_params=pltpu.CompilerParams(
            # Axis 1 MUST stay 'arbitrary' (sequential) so the K/V-projection hoist
            # (@pl.when(program_id(1)==0)) sees i=0 first for every batch element.
            dimension_semantics=("parallel", "arbitrary"),
            vmem_limit_bytes=vmem_limit),
    )(queries, keys, values, wq_c, bq, wk_c, bk, wv_c, bv, wo_c, bo)

    if output_attention:
        out, attn = res
        return out, attn
    return res[0], None


def reference(queries, keys, values, params, n_heads):
    """Plain-JAX replica of the PyTorch forward for verification."""
    wq, bq, wk, bk, wv, bv, wo, bo = params
    B, L, D = queries.shape
    _, S, _ = keys.shape
    d_k = wq.shape[1] // n_heads
    d_v = wv.shape[1] // n_heads
    Q = (queries @ wq + bq).reshape(B, L, n_heads, d_k)
    K = (keys @ wk + bk).reshape(B, S, n_heads, d_k)
    V = (values @ wv + bv).reshape(B, S, n_heads, d_v)
    scores = jnp.einsum("blhe,bshe->bhls", Q, K) / math.sqrt(d_k)
    A = jax.nn.softmax(scores, axis=-1)
    out = jnp.einsum("bhls,bshd->blhd", A, V).reshape(B, L, n_heads * d_v)
    return out @ wo + bo, A


def init_params(key, d_model, n_heads):
    d_k = d_model // n_heads
    d_v = d_model // n_heads
    ks = jax.random.split(key, 8)

    def lin(kw, kb, fan_in, fan_out):
        bound = 1.0 / math.sqrt(fan_in)
        w = jax.random.uniform(kw, (fan_in, fan_out), jnp.float32, -bound, bound)
        b = jax.random.uniform(kb, (1, fan_out), jnp.float32, -bound, bound)
        return w, b

    wq, bq = lin(ks[0], ks[1], d_model, d_k * n_heads)
    wk, bk = lin(ks[2], ks[3], d_model, d_k * n_heads)
    wv, bv = lin(ks[4], ks[5], d_model, d_v * n_heads)
    wo, bo = lin(ks[6], ks[7], d_v * n_heads, d_model)
    return (wq, bq, wk, bk, wv, bv, wo, bo)


if __name__ == "__main__":
    B, L, S, d_model, n_heads = 2, 8, 8, 32, 4

    key = jax.random.PRNGKey(0)
    kq, kk, kv, kp = jax.random.split(key, 4)
    queries = jax.random.normal(kq, (B, L, d_model), jnp.float32)
    keys_in = jax.random.normal(kk, (B, S, d_model), jnp.float32)
    values_in = jax.random.normal(kv, (B, S, d_model), jnp.float32)
    params = init_params(kp, d_model, n_heads)

    out, attn = attention_layer(queries, keys_in, values_in, None, params, n_heads,
                                output_attention=True)
    out = jax.block_until_ready(out)
    attn = jax.block_until_ready(attn)

    out_ref, attn_ref = reference(queries, keys_in, values_in, params, n_heads)
    # bf16 MXU operands / bf16 attn output (f32 accumulation) + approx reciprocal
    # -> slightly looser tolerance.
    np.testing.assert_allclose(np.asarray(out), np.asarray(out_ref),
                               atol=5e-2, rtol=5e-2)
    np.testing.assert_allclose(np.asarray(attn.astype(jnp.float32)),
                               np.asarray(attn_ref), atol=5e-2, rtol=5e-2)

    # Fast path: skip the O(B*H*L*S) attention-probability writeback entirely.
    out2, attn2 = attention_layer(queries, keys_in, values_in, None, params, n_heads,
                                  output_attention=False)
    out2 = jax.block_until_ready(out2)
    assert attn2 is None
    np.testing.assert_allclose(np.asarray(out2), np.asarray(out_ref),
                               atol=5e-2, rtol=5e-2)

    print("KERNEL_OK")
</pallas_src>

<mosaic_0001>
module attributes {stable_mosaic.version = 11 : i64} {
  func.func @_attention_layer_kernel(%arg0: i32, %arg1: i32, %arg2: memref<1x8x32xf32, #tpu.memory_space<vmem>>, %arg3: memref<1x8x32xf32, #tpu.memory_space<vmem>>, %arg4: memref<1x8x32xf32, #tpu.memory_space<vmem>>, %arg5: memref<32x32xbf16, #tpu.memory_space<vmem>>, %arg6: memref<1x32xf32, #tpu.memory_space<vmem>>, %arg7: memref<32x32xbf16, #tpu.memory_space<vmem>>, %arg8: memref<1x32xf32, #tpu.memory_space<vmem>>, %arg9: memref<32x32xbf16, #tpu.memory_space<vmem>>, %arg10: memref<1x32xf32, #tpu.memory_space<vmem>>, %arg11: memref<32x32xbf16, #tpu.memory_space<vmem>>, %arg12: memref<1x32xf32, #tpu.memory_space<vmem>>, %arg13: memref<1x8x32xf32, #tpu.memory_space<vmem>>, %arg14: memref<1x4x8x8xbf16, #tpu.memory_space<vmem>>, %arg15: memref<4x8x8xbf16, #tpu.memory_space<vmem>>, %arg16: memref<4x8x8xbf16, #tpu.memory_space<vmem>>, %arg17: memref<4x8x8xbf16, #tpu.memory_space<vmem>>, %arg18: memref<8x32xbf16, #tpu.memory_space<vmem>>) attributes {dimension_semantics = [#tpu.dimension_semantics<parallel>, #tpu.dimension_semantics<arbitrary>], iteration_bounds = array<i64: 2, 1>, scalar_prefetch = 0 : i64, scratch_operands = 4 : i64, tpu.core_type = #tpu.core_type<tc>, window_params = [{transform_indices = @transform_0, window_bounds = array<i64: 1, 8, 32>}, {transform_indices = @transform_1, window_bounds = array<i64: 1, 8, 32>}, {transform_indices = @transform_2, window_bounds = array<i64: 1, 8, 32>}, {pipeline_mode = #tpu.pipeline_mode<synchronous>, transform_indices = @transform_3, window_bounds = array<i64: 32, 32>}, {pipeline_mode = #tpu.pipeline_mode<synchronous>, transform_indices = @transform_4, window_bounds = array<i64: 1, 32>}, {pipeline_mode = #tpu.pipeline_mode<synchronous>, transform_indices = @transform_5, window_bounds = array<i64: 32, 32>}, {pipeline_mode = #tpu.pipeline_mode<synchronous>, transform_indices = @transform_6, window_bounds = array<i64: 1, 32>}, {pipeline_mode = #tpu.pipeline_mode<synchronous>, transform_indices = @transform_7, window_bounds = array<i64: 32, 32>}, {pipeline_mode = #tpu.pipeline_mode<synchronous>, transform_indices = @transform_8, window_bounds = array<i64: 1, 32>}, {pipeline_mode = #tpu.pipeline_mode<synchronous>, transform_indices = @transform_9, window_bounds = array<i64: 32, 32>}, {pipeline_mode = #tpu.pipeline_mode<synchronous>, transform_indices = @transform_10, window_bounds = array<i64: 1, 32>}, {transform_indices = @transform_11, window_bounds = array<i64: 1, 8, 32>}, {transform_indices = @transform_12, window_bounds = array<i64: 1, 4, 8, 8>}]} {
    %c0_i32 = arith.constant 0 : i32
    %0 = arith.cmpi eq, %arg1, %c0_i32 : i32
    %1 = arith.extui %0 : i1 to i32
    %c0_i32_0 = arith.constant 0 : i32
    %2 = arith.cmpi ne, %1, %c0_i32_0 : i32
    scf.if %2 {
      %c0_49 = arith.constant 0 : index
      %c0_50 = arith.constant 0 : index
      %c0_51 = arith.constant 0 : index
      %72 = vector.load %arg3[%c0_49, %c0_50, %c0_51] : memref<1x8x32xf32, #tpu.memory_space<vmem>>, vector<1x8x32xf32>
      %73 = vector.shape_cast %72 : vector<1x8x32xf32> to vector<8x32xf32>
      %74 = arith.truncf %73 : vector<8x32xf32> to vector<8x32xbf16>
      %c0_52 = arith.constant 0 : index
      %c0_53 = arith.constant 0 : index
      %c0_54 = arith.constant 0 : index
      %75 = vector.load %arg4[%c0_52, %c0_53, %c0_54] : memref<1x8x32xf32, #tpu.memory_space<vmem>>, vector<1x8x32xf32>
      %76 = vector.shape_cast %75 : vector<1x8x32xf32> to vector<8x32xf32>
      %77 = arith.truncf %76 : vector<8x32xf32> to vector<8x32xbf16>
      %c0_55 = arith.constant 0 : index
      %c0_56 = arith.constant 0 : index
      %78 = vector.load %arg7[%c0_55, %c0_56] : memref<32x32xbf16, #tpu.memory_space<vmem>>, vector<32x32xbf16>
      %cst_57 = arith.constant dense<0.000000e+00> : vector<8x32xf32>
      %79 = tpu.matmul %74, %78, %cst_57 {dimension_numbers = #tpu.dot_dimension_numbers<[1], [0], [0], [1], [0, 0, 1, 1], [], []>} : vector<8x32xbf16>, vector<32x32xbf16>, vector<8x32xf32> -> vector<8x32xf32>
      %c0_58 = arith.constant 0 : index
      %c0_59 = arith.constant 0 : index
      %80 = vector.load %arg8[%c0_58, %c0_59] : memref<1x32xf32, #tpu.memory_space<vmem>>, vector<1x32xf32>
      %81 = vector.broadcast %80 : vector<1x32xf32> to vector<8x32xf32>
      %82 = arith.addf %79, %81 : vector<8x32xf32>
      %83 = arith.truncf %82 : vector<8x32xf32> to vector<8x32xbf16>
      %c0_60 = arith.constant 0 : index
      %c0_61 = arith.constant 0 : index
      %84 = vector.load %arg9[%c0_60, %c0_61] : memref<32x32xbf16, #tpu.memory_space<vmem>>, vector<32x32xbf16>
      %cst_62 = arith.constant dense<0.000000e+00> : vector<8x32xf32>
      %85 = tpu.matmul %77, %84, %cst_62 {dimension_numbers = #tpu.dot_dimension_numbers<[1], [0], [0], [1], [0, 0, 1, 1], [], []>} : vector<8x32xbf16>, vector<32x32xbf16>, vector<8x32xf32> -> vector<8x32xf32>
      %c0_63 = arith.constant 0 : index
      %c0_64 = arith.constant 0 : index
      %86 = vector.load %arg10[%c0_63, %c0_64] : memref<1x32xf32, #tpu.memory_space<vmem>>, vector<1x32xf32>
      %87 = vector.broadcast %86 : vector<1x32xf32> to vector<8x32xf32>
      %88 = arith.addf %85, %87 : vector<8x32xf32>
      %89 = arith.truncf %88 : vector<8x32xf32> to vector<8x32xbf16>
      %90 = vector.extract_strided_slice %83 {offsets = [0, 0], sizes = [8, 8], strides = [1, 1]} : vector<8x32xbf16> to vector<8x8xbf16>
      %c0_65 = arith.constant 0 : index
      %c0_66 = arith.constant 0 : index
      %c0_67 = arith.constant 0 : index
      %91 = vector.load %arg16[%c0_65, %c0_66, %c0_67] : memref<4x8x8xbf16, #tpu.memory_space<vmem>>, vector<1x8x8xbf16>
      %92 = vector.shape_cast %91 : vector<1x8x8xbf16> to vector<8x8xbf16>
      %93 = vector.shape_cast %90 : vector<8x8xbf16> to vector<1x8x8xbf16>
      tpu.vector_store %arg16[%c0_65, %c0_66, %c0_67], %93 {strides = array<i32>} : memref<4x8x8xbf16, #tpu.memory_space<vmem>>, vector<1x8x8xbf16>,
      %94 = vector.extract_strided_slice %89 {offsets = [0, 0], sizes = [8, 8], strides = [1, 1]} : vector<8x32xbf16> to vector<8x8xbf16>
      %c0_68 = arith.constant 0 : index
      %c0_69 = arith.constant 0 : index
      %c0_70 = arith.constant 0 : index
      %95 = vector.load %arg17[%c0_68, %c0_69, %c0_70] : memref<4x8x8xbf16, #tpu.memory_space<vmem>>, vector<1x8x8xbf16>
      %96 = vector.shape_cast %95 : vector<1x8x8xbf16> to vector<8x8xbf16>
      %97 = vector.shape_cast %94 : vector<8x8xbf16> to vector<1x8x8xbf16>
      tpu.vector_store %arg17[%c0_68, %c0_69, %c0_70], %97 {strides = array<i32>} : memref<4x8x8xbf16, #tpu.memory_space<vmem>>, vector<1x8x8xbf16>,
      %98 = vector.extract_strided_slice %83 {offsets = [0, 8], sizes = [8, 8], strides = [1, 1]} : vector<8x32xbf16> to vector<8x8xbf16>
      %c1_71 = arith.constant 1 : index
      %c0_72 = arith.constant 0 : index
      %c0_73 = arith.constant 0 : index
      %99 = vector.load %arg16[%c1_71, %c0_72, %c0_73] : memref<4x8x8xbf16, #tpu.memory_space<vmem>>, vector<1x8x8xbf16>
      %100 = vector.shape_cast %99 : vector<1x8x8xbf16> to vector<8x8xbf16>
      %101 = vector.shape_cast %98 : vector<8x8xbf16> to vector<1x8x8xbf16>
      tpu.vector_store %arg16[%c1_71, %c0_72, %c0_73], %101 {strides = array<i32>} : memref<4x8x8xbf16, #tpu.memory_space<vmem>>, vector<1x8x8xbf16>,
      %102 = vector.extract_strided_slice %89 {offsets = [0, 8], sizes = [8, 8], strides = [1, 1]} : vector<8x32xbf16> to vector<8x8xbf16>
      %c1_74 = arith.constant 1 : index
      %c0_75 = arith.constant 0 : index
      %c0_76 = arith.constant 0 : index
      %103 = vector.load %arg17[%c1_74, %c0_75, %c0_76] : memref<4x8x8xbf16, #tpu.memory_space<vmem>>, vector<1x8x8xbf16>
      %104 = vector.shape_cast %103 : vector<1x8x8xbf16> to vector<8x8xbf16>
      %105 = vector.shape_cast %102 : vector<8x8xbf16> to vector<1x8x8xbf16>
      tpu.vector_store %arg17[%c1_74, %c0_75, %c0_76], %105 {strides = array<i32>} : memref<4x8x8xbf16, #tpu.memory_space<vmem>>, vector<1x8x8xbf16>,
      %106 = vector.extract_strided_slice %83 {offsets = [0, 16], sizes = [8, 8], strides = [1, 1]} : vector<8x32xbf16> to vector<8x8xbf16>
      %c2_77 = arith.constant 2 : index
      %c0_78 = arith.constant 0 : index
      %c0_79 = arith.constant 0 : index
      %107 = vector.load %arg16[%c2_77, %c0_78, %c0_79] : memref<4x8x8xbf16, #tpu.memory_space<vmem>>, vector<1x8x8xbf16>
      %108 = vector.shape_cast %107 : vector<1x8x8xbf16> to vector<8x8xbf16>
      %109 = vector.shape_cast %106 : vector<8x8xbf16> to vector<1x8x8xbf16>
      tpu.vector_store %arg16[%c2_77, %c0_78, %c0_79], %109 {strides = array<i32>} : memref<4x8x8xbf16, #tpu.memory_space<vmem>>, vector<1x8x8xbf16>,
      %110 = vector.extract_strided_slice %89 {offsets = [0, 16], sizes = [8, 8], strides = [1, 1]} : vector<8x32xbf16> to vector<8x8xbf16>
      %c2_80 = arith.constant 2 : index
      %c0_81 = arith.constant 0 : index
      %c0_82 = arith.constant 0 : index
      %111 = vector.load %arg17[%c2_80, %c0_81, %c0_82] : memref<4x8x8xbf16, #tpu.memory_space<vmem>>, vector<1x8x8xbf16>
      %112 = vector.shape_cast %111 : vector<1x8x8xbf16> to vector<8x8xbf16>
      %113 = vector.shape_cast %110 : vector<8x8xbf16> to vector<1x8x8xbf16>
      tpu.vector_store %arg17[%c2_80, %c0_81, %c0_82], %113 {strides = array<i32>} : memref<4x8x8xbf16, #tpu.memory_space<vmem>>, vector<1x8x8xbf16>,
      %114 = vector.extract_strided_slice %83 {offsets = [0, 24], sizes = [8, 8], strides = [1, 1]} : vector<8x32xbf16> to vector<8x8xbf16>
      %c3_83 = arith.constant 3 : index
      %c0_84 = arith.constant 0 : index
      %c0_85 = arith.constant 0 : index
      %115 = vector.load %arg16[%c3_83, %c0_84, %c0_85] : memref<4x8x8xbf16, #tpu.memory_space<vmem>>, vector<1x8x8xbf16>
      %116 = vector.shape_cast %115 : vector<1x8x8xbf16> to vector<8x8xbf16>
      %117 = vector.shape_cast %114 : vector<8x8xbf16> to vector<1x8x8xbf16>
      tpu.vector_store %arg16[%c3_83, %c0_84, %c0_85], %117 {strides = array<i32>} : memref<4x8x8xbf16, #tpu.memory_space<vmem>>, vector<1x8x8xbf16>,
      %118 = vector.extract_strided_slice %89 {offsets = [0, 24], sizes = [8, 8], strides = [1, 1]} : vector<8x32xbf16> to vector<8x8xbf16>
      %c3_86 = arith.constant 3 : index
      %c0_87 = arith.constant 0 : index
      %c0_88 = arith.constant 0 : index
      %119 = vector.load %arg17[%c3_86, %c0_87, %c0_88] : memref<4x8x8xbf16, #tpu.memory_space<vmem>>, vector<1x8x8xbf16>
      %120 = vector.shape_cast %119 : vector<1x8x8xbf16> to vector<8x8xbf16>
      %121 = vector.shape_cast %118 : vector<8x8xbf16> to vector<1x8x8xbf16>
      tpu.vector_store %arg17[%c3_86, %c0_87, %c0_88], %121 {strides = array<i32>} : memref<4x8x8xbf16, #tpu.memory_space<vmem>>, vector<1x8x8xbf16>,
    } else {
    }
    %c0 = arith.constant 0 : index
    %c0_1 = arith.constant 0 : index
    %c0_2 = arith.constant 0 : index
    %3 = vector.load %arg2[%c0, %c0_1, %c0_2] : memref<1x8x32xf32, #tpu.memory_space<vmem>>, vector<1x8x32xf32>
    %4 = vector.shape_cast %3 : vector<1x8x32xf32> to vector<8x32xf32>
    %5 = arith.truncf %4 : vector<8x32xf32> to vector<8x32xbf16>
    %c0_3 = arith.constant 0 : index
    %c0_4 = arith.constant 0 : index
    %6 = vector.load %arg5[%c0_3, %c0_4] : memref<32x32xbf16, #tpu.memory_space<vmem>>, vector<32x32xbf16>
    %cst = arith.constant dense<0.000000e+00> : vector<8x32xf32>
    %7 = tpu.matmul %5, %6, %cst {dimension_numbers = #tpu.dot_dimension_numbers<[1], [0], [0], [1], [0, 0, 1, 1], [], []>} : vector<8x32xbf16>, vector<32x32xbf16>, vector<8x32xf32> -> vector<8x32xf32>
    %c0_5 = arith.constant 0 : index
    %c0_6 = arith.constant 0 : index
    %8 = vector.load %arg6[%c0_5, %c0_6] : memref<1x32xf32, #tpu.memory_space<vmem>>, vector<1x32xf32>
    %9 = vector.broadcast %8 : vector<1x32xf32> to vector<8x32xf32>
    %10 = arith.addf %7, %9 : vector<8x32xf32>
    %cst_7 = arith.constant 0.353553385 : f32
    %11 = vector.broadcast %cst_7 : f32 to vector<8x32xf32>
    %12 = arith.mulf %10, %11 : vector<8x32xf32>
    %13 = arith.truncf %12 : vector<8x32xf32> to vector<8x32xbf16>
    %14 = vector.extract_strided_slice %13 {offsets = [0, 0], sizes = [8, 8], strides = [1, 1]} : vector<8x32xbf16> to vector<8x8xbf16>
    %c0_8 = arith.constant 0 : index
    %c0_9 = arith.constant 0 : index
    %c0_10 = arith.constant 0 : index
    %15 = vector.load %arg15[%c0_8, %c0_9, %c0_10] : memref<4x8x8xbf16, #tpu.memory_space<vmem>>, vector<1x8x8xbf16>
    %16 = vector.shape_cast %15 : vector<1x8x8xbf16> to vector<8x8xbf16>
    %17 = vector.shape_cast %14 : vector<8x8xbf16> to vector<1x8x8xbf16>
    tpu.vector_store %arg15[%c0_8, %c0_9, %c0_10], %17 {strides = array<i32>} : memref<4x8x8xbf16, #tpu.memory_space<vmem>>, vector<1x8x8xbf16>,
    %18 = vector.extract_strided_slice %13 {offsets = [0, 8], sizes = [8, 8], strides = [1, 1]} : vector<8x32xbf16> to vector<8x8xbf16>
    %c1 = arith.constant 1 : index
    %c0_11 = arith.constant 0 : index
    %c0_12 = arith.constant 0 : index
    %19 = vector.load %arg15[%c1, %c0_11, %c0_12] : memref<4x8x8xbf16, #tpu.memory_space<vmem>>, vector<1x8x8xbf16>
    %20 = vector.shape_cast %19 : vector<1x8x8xbf16> to vector<8x8xbf16>
    %21 = vector.shape_cast %18 : vector<8x8xbf16> to vector<1x8x8xbf16>
    tpu.vector_store %arg15[%c1, %c0_11, %c0_12], %21 {strides = array<i32>} : memref<4x8x8xbf16, #tpu.memory_space<vmem>>, vector<1x8x8xbf16>,
    %22 = vector.extract_strided_slice %13 {offsets = [0, 16], sizes = [8, 8], strides = [1, 1]} : vector<8x32xbf16> to vector<8x8xbf16>
    %c2 = arith.constant 2 : index
    %c0_13 = arith.constant 0 : index
    %c0_14 = arith.constant 0 : index
    %23 = vector.load %arg15[%c2, %c0_13, %c0_14] : memref<4x8x8xbf16, #tpu.memory_space<vmem>>, vector<1x8x8xbf16>
    %24 = vector.shape_cast %23 : vector<1x8x8xbf16> to vector<8x8xbf16>
    %25 = vector.shape_cast %22 : vector<8x8xbf16> to vector<1x8x8xbf16>
    tpu.vector_store %arg15[%c2, %c0_13, %c0_14], %25 {strides = array<i32>} : memref<4x8x8xbf16, #tpu.memory_space<vmem>>, vector<1x8x8xbf16>,
    %26 = vector.extract_strided_slice %13 {offsets = [0, 24], sizes = [8, 8], strides = [1, 1]} : vector<8x32xbf16> to vector<8x8xbf16>
    %c3 = arith.constant 3 : index
    %c0_15 = arith.constant 0 : index
    %c0_16 = arith.constant 0 : index
    %27 = vector.load %arg15[%c3, %c0_15, %c0_16] : memref<4x8x8xbf16, #tpu.memory_space<vmem>>, vector<1x8x8xbf16>
    %28 = vector.shape_cast %27 : vector<1x8x8xbf16> to vector<8x8xbf16>
    %29 = vector.shape_cast %26 : vector<8x8xbf16> to vector<1x8x8xbf16>
    tpu.vector_store %arg15[%c3, %c0_15, %c0_16], %29 {strides = array<i32>} : memref<4x8x8xbf16, #tpu.memory_space<vmem>>, vector<1x8x8xbf16>,
    %c0_17 = arith.constant 0 : index
    %c0_18 = arith.constant 0 : index
    %c0_19 = arith.constant 0 : index
    %30 = vector.load %arg15[%c0_17, %c0_18, %c0_19] : memref<4x8x8xbf16, #tpu.memory_space<vmem>>, vector<4x8x8xbf16>
    %c0_20 = arith.constant 0 : index
    %c0_21 = arith.constant 0 : index
    %c0_22 = arith.constant 0 : index
    %31 = vector.load %arg16[%c0_20, %c0_21, %c0_22] : memref<4x8x8xbf16, #tpu.memory_space<vmem>>, vector<4x8x8xbf16>
    %c0_23 = arith.constant 0 : index
    %c0_24 = arith.constant 0 : index
    %c0_25 = arith.constant 0 : index
    %32 = vector.load %arg17[%c0_23, %c0_24, %c0_25] : memref<4x8x8xbf16, #tpu.memory_space<vmem>>, vector<4x8x8xbf16>
    "tpu.trace_start"() <{level = 10 : i32, message = "hqe,hke->hqk"}> : () -> ()
    %cst_26 = arith.constant dense<0.000000e+00> : vector<4x8x8xf32>
    %33 = tpu.matmul %30, %31, %cst_26 {dimension_numbers = #tpu.dot_dimension_numbers<[2], [2], [1], [1], [0, 0, 0, 1, 1, 1], [0], [0]>} : vector<4x8x8xbf16>, vector<4x8x8xbf16>, vector<4x8x8xf32> -> vector<4x8x8xf32>
    "tpu.trace_stop"() : () -> ()
    %cst_27 = arith.constant dense<0xFF800000> : vector<4x8xf32>
    %34 = vector.multi_reduction <maximumf>, %33, %cst_27 [2] : vector<4x8x8xf32> to vector<4x8xf32>
    %35 = vector.shape_cast %34 : vector<4x8xf32> to vector<4x8x1xf32>
    %36 = vector.broadcast %35 : vector<4x8x1xf32> to vector<4x8x8xf32>
    %37 = arith.subf %33, %36 : vector<4x8x8xf32>
    %38 = math.exp %37 : vector<4x8x8xf32>
    %cst_28 = arith.constant dense<0.000000e+00> : vector<4x8xf32>
    %39 = vector.multi_reduction <add>, %38, %cst_28 [2] : vector<4x8x8xf32> to vector<4x8xf32>
    %40 = vector.shape_cast %39 : vector<4x8xf32> to vector<4x8x1xf32>
    %41 = tpu.reciprocal %40 {approx = true} : vector<4x8x1xf32> -> vector<4x8x1xf32>
    %42 = vector.broadcast %41 : vector<4x8x1xf32> to vector<4x8x8xf32>
    %43 = arith.mulf %38, %42 : vector<4x8x8xf32>
    %44 = arith.truncf %43 : vector<4x8x8xf32> to vector<4x8x8xbf16>
    %c0_29 = arith.constant 0 : index
    %c0_30 = arith.constant 0 : index
    %c0_31 = arith.constant 0 : index
    %c0_32 = arith.constant 0 : index
    %45 = vector.load %arg14[%c0_29, %c0_30, %c0_31, %c0_32] : memref<1x4x8x8xbf16, #tpu.memory_space<vmem>>, vector<1x4x8x8xbf16>
    %46 = vector.shape_cast %45 : vector<1x4x8x8xbf16> to vector<4x8x8xbf16>
    %47 = vector.shape_cast %44 : vector<4x8x8xbf16> to vector<1x4x8x8xbf16>
    tpu.vector_store %arg14[%c0_29, %c0_30, %c0_31, %c0_32], %47 {strides = array<i32>} : memref<1x4x8x8xbf16, #tpu.memory_space<vmem>>, vector<1x4x8x8xbf16>,
    %48 = arith.truncf %43 : vector<4x8x8xf32> to vector<4x8x8xbf16>
    "tpu.trace_start"() <{level = 10 : i32, message = "hqk,hkv->hqv"}> : () -> ()
    %cst_33 = arith.constant dense<0.000000e+00> : vector<4x8x8xf32>
    %49 = tpu.matmul %48, %32, %cst_33 {dimension_numbers = #tpu.dot_dimension_numbers<[2], [1], [1], [2], [0, 0, 0, 1, 1, 2], [0], [0]>} : vector<4x8x8xbf16>, vector<4x8x8xbf16>, vector<4x8x8xf32> -> vector<4x8x8xf32>
    "tpu.trace_stop"() : () -> ()
    %50 = arith.truncf %49 : vector<4x8x8xf32> to vector<4x8x8xbf16>
    %51 = vector.extract_strided_slice %50 {offsets = [0, 0, 0], sizes = [1, 8, 8], strides = [1, 1, 1]} : vector<4x8x8xbf16> to vector<1x8x8xbf16>
    %52 = vector.shape_cast %51 : vector<1x8x8xbf16> to vector<8x8xbf16>
    %c0_34 = arith.constant 0 : index
    %c0_35 = arith.constant 0 : index
    %53 = vector.load %arg18[%c0_34, %c0_35] : memref<8x32xbf16, #tpu.memory_space<vmem>>, vector<8x8xbf16>
    tpu.vector_store %arg18[%c0_34, %c0_35], %52 {strides = array<i32>} : memref<8x32xbf16, #tpu.memory_space<vmem>>, vector<8x8xbf16>,
    %54 = vector.extract_strided_slice %50 {offsets = [1, 0, 0], sizes = [1, 8, 8], strides = [1, 1, 1]} : vector<4x8x8xbf16> to vector<1x8x8xbf16>
    %55 = vector.shape_cast %54 : vector<1x8x8xbf16> to vector<8x8xbf16>
    %c0_36 = arith.constant 0 : index
    %c8 = arith.constant 8 : index
    %56 = vector.load %arg18[%c0_36, %c8] : memref<8x32xbf16, #tpu.memory_space<vmem>>, vector<8x8xbf16>
    tpu.vector_store %arg18[%c0_36, %c8], %55 {strides = array<i32>} : memref<8x32xbf16, #tpu.memory_space<vmem>>, vector<8x8xbf16>,
    %57 = vector.extract_strided_slice %50 {offsets = [2, 0, 0], sizes = [1, 8, 8], strides = [1, 1, 1]} : vector<4x8x8xbf16> to vector<1x8x8xbf16>
    %58 = vector.shape_cast %57 : vector<1x8x8xbf16> to vector<8x8xbf16>
    %c0_37 = arith.constant 0 : index
    %c16 = arith.constant 16 : index
    %59 = vector.load %arg18[%c0_37, %c16] : memref<8x32xbf16, #tpu.memory_space<vmem>>, vector<8x8xbf16>
    tpu.vector_store %arg18[%c0_37, %c16], %58 {strides = array<i32>} : memref<8x32xbf16, #tpu.memory_space<vmem>>, vector<8x8xbf16>,
    %60 = vector.extract_strided_slice %50 {offsets = [3, 0, 0], sizes = [1, 8, 8], strides = [1, 1, 1]} : vector<4x8x8xbf16> to vector<1x8x8xbf16>
    %61 = vector.shape_cast %60 : vector<1x8x8xbf16> to vector<8x8xbf16>
    %c0_38 = arith.constant 0 : index
    %c24 = arith.constant 24 : index
    %62 = vector.load %arg18[%c0_38, %c24] : memref<8x32xbf16, #tpu.memory_space<vmem>>, vector<8x8xbf16>
    tpu.vector_store %arg18[%c0_38, %c24], %61 {strides = array<i32>} : memref<8x32xbf16, #tpu.memory_space<vmem>>, vector<8x8xbf16>,
    %c0_39 = arith.constant 0 : index
    %c0_40 = arith.constant 0 : index
    %63 = vector.load %arg18[%c0_39, %c0_40] : memref<8x32xbf16, #tpu.memory_space<vmem>>, vector<8x32xbf16>
    %c0_41 = arith.constant 0 : index
    %c0_42 = arith.constant 0 : index
    %64 = vector.load %arg11[%c0_41, %c0_42] : memref<32x32xbf16, #tpu.memory_space<vmem>>, vector<32x32xbf16>
    %cst_43 = arith.constant dense<0.000000e+00> : vector<8x32xf32>
    %65 = tpu.matmul %63, %64, %cst_43 {dimension_numbers = #tpu.dot_dimension_numbers<[1], [0], [0], [1], [0, 0, 1, 1], [], []>} : vector<8x32xbf16>, vector<32x32xbf16>, vector<8x32xf32> -> vector<8x32xf32>
    %c0_44 = arith.constant 0 : index
    %c0_45 = arith.constant 0 : index
    %66 = vector.load %arg12[%c0_44, %c0_45] : memref<1x32xf32, #tpu.memory_space<vmem>>, vector<1x32xf32>
    %67 = vector.broadcast %66 : vector<1x32xf32> to vector<8x32xf32>
    %68 = arith.addf %65, %67 : vector<8x32xf32>
    %c0_46 = arith.constant 0 : index
    %c0_47 = arith.constant 0 : index
    %c0_48 = arith.constant 0 : index
    %69 = vector.load %arg13[%c0_46, %c0_47, %c0_48] : memref<1x8x32xf32, #tpu.memory_space<vmem>>, vector<1x8x32xf32>
    %70 = vector.shape_cast %69 : vector<1x8x32xf32> to vector<8x32xf32>
    %71 = vector.shape_cast %68 : vector<8x32xf32> to vector<1x8x32xf32>
    tpu.vector_store %arg13[%c0_46, %c0_47, %c0_48], %71 {strides = array<i32>} : memref<1x8x32xf32, #tpu.memory_space<vmem>>, vector<1x8x32xf32>,
    return
  }
  func.func @transform_0(%arg0: i32, %arg1: i32) -> (i32, i32, i32) {
    %c0_i32 = arith.constant 0 : i32
    %c0_i32_0 = arith.constant 0 : i32
    return %arg0, %arg1, %c0_i32 : i32, i32, i32
  }
  func.func @transform_1(%arg0: i32, %arg1: i32) -> (i32, i32, i32) {
    %c0_i32 = arith.constant 0 : i32
    %c0_i32_0 = arith.constant 0 : i32
    %c0_i32_1 = arith.constant 0 : i32
    return %arg0, %c0_i32, %c0_i32_0 : i32, i32, i32
  }
  func.func @transform_2(%arg0: i32, %arg1: i32) -> (i32, i32, i32) {
    %c0_i32 = arith.constant 0 : i32
    %c0_i32_0 = arith.constant 0 : i32
    %c0_i32_1 = arith.constant 0 : i32
    return %arg0, %c0_i32, %c0_i32_0 : i32, i32, i32
  }
  func.func @transform_3(%arg0: i32, %arg1: i32) -> (i32, i32) {
    %c0_i32 = arith.constant 0 : i32
    %c0_i32_0 = arith.constant 0 : i32
    %c0_i32_1 = arith.constant 0 : i32
    return %c0_i32, %c0_i32_0 : i32, i32
  }
  func.func @transform_4(%arg0: i32, %arg1: i32) -> (i32, i32) {
    %c0_i32 = arith.constant 0 : i32
    %c0_i32_0 = arith.constant 0 : i32
    %c0_i32_1 = arith.constant 0 : i32
    return %c0_i32, %c0_i32_0 : i32, i32
  }
  func.func @transform_5(%arg0: i32, %arg1: i32) -> (i32, i32) {
    %c0_i32 = arith.constant 0 : i32
    %c0_i32_0 = arith.constant 0 : i32
    %c0_i32_1 = arith.constant 0 : i32
    return %c0_i32, %c0_i32_0 : i32, i32
  }
  func.func @transform_6(%arg0: i32, %arg1: i32) -> (i32, i32) {
    %c0_i32 = arith.constant 0 : i32
    %c0_i32_0 = arith.constant 0 : i32
    %c0_i32_1 = arith.constant 0 : i32
    return %c0_i32, %c0_i32_0 : i32, i32
  }
  func.func @transform_7(%arg0: i32, %arg1: i32) -> (i32, i32) {
    %c0_i32 = arith.constant 0 : i32
    %c0_i32_0 = arith.constant 0 : i32
    %c0_i32_1 = arith.constant 0 : i32
    return %c0_i32, %c0_i32_0 : i32, i32
  }
  func.func @transform_8(%arg0: i32, %arg1: i32) -> (i32, i32) {
    %c0_i32 = arith.constant 0 : i32
    %c0_i32_0 = arith.constant 0 : i32
    %c0_i32_1 = arith.constant 0 : i32
    return %c0_i32, %c0_i32_0 : i32, i32
  }
  func.func @transform_9(%arg0: i32, %arg1: i32) -> (i32, i32) {
    %c0_i32 = arith.constant 0 : i32
    %c0_i32_0 = arith.constant 0 : i32
    %c0_i32_1 = arith.constant 0 : i32
    return %c0_i32, %c0_i32_0 : i32, i32
  }
  func.func @transform_10(%arg0: i32, %arg1: i32) -> (i32, i32) {
    %c0_i32 = arith.constant 0 : i32
    %c0_i32_0 = arith.constant 0 : i32
    %c0_i32_1 = arith.constant 0 : i32
    return %c0_i32, %c0_i32_0 : i32, i32
  }
  func.func @transform_11(%arg0: i32, %arg1: i32) -> (i32, i32, i32) {
    %c0_i32 = arith.constant 0 : i32
    %c0_i32_0 = arith.constant 0 : i32
    return %arg0, %arg1, %c0_i32 : i32, i32, i32
  }
  func.func @transform_12(%arg0: i32, %arg1: i32) -> (i32, i32, i32, i32) {
    %c0_i32 = arith.constant 0 : i32
    %c0_i32_0 = arith.constant 0 : i32
    %c0_i32_1 = arith.constant 0 : i32
    return %arg0, %c0_i32, %arg1, %c0_i32_0 : i32, i32, i32, i32
  }
}

</mosaic_0001>

<bundles_post_ra>
// kernel: tpu_custom_call.1
= control target key start
LH: loop header
LB: loop body
LE: loop exit
PB: predicated region body
PF: predicated region fallthrough
CT: control target
= control target key end

     0   :  { %s2258_s0 = inlined_call_operand.hbm [shape: f32[2,8,32], index: 0, kind: input, shape index: {}]   ;;  %s2259_s1 = inlined_call_operand.hbm [shape: f32[2,8,32], index: 1, kind: input, shape index: {}]   ;;  %s2260_s2 = inlined_call_operand.hbm [shape: f32[2,8,32], index: 2, kind: input, shape index: {}]   ;;  %s2261_s3 = inlined_call_operand.hbm [shape: bf16[32,32], index: 3, kind: input, shape index: {}]   ;;  %s2262_s4 = inlined_call_operand.vmem [shape: f32[1,32], index: 4, kind: input, shape index: {}]   ;;  %s2263_s5 = inlined_call_operand.hbm [shape: bf16[32,32], index: 5, kind: input, shape index: {}]   ;;  %s2264_s6 = inlined_call_operand.vmem [shape: f32[1,32], index: 6, kind: input, shape index: {}]   ;;  %s2265_s7 = inlined_call_operand.hbm [shape: bf16[32,32], index: 7, kind: input, shape index: {}]   ;;  %s2266_s8 = inlined_call_operand.vmem [shape: f32[1,32], index: 8, kind: input, shape index: {}]   ;;  %s2267_s9 = inlined_call_operand.hbm [shape: bf16[32,32], index: 9, kind: input, shape index: {}]   ;;  %s2268_s10 = inlined_call_operand.vmem [shape: f32[1,32], index: 10, kind: input, shape index: {}]   ;;  %s2269_s11 = inlined_call_operand.hbm [shape: f32[2,8,32], index: 11, kind: output, shape index: {0}]   ;;  %s2270_s12 = inlined_call_operand.hbm [shape: bf16[2,4,8,8], index: 12, kind: output, shape index: {1}]  }
   0x1   :  { %2284 = sst [smem:[#allocation33_spill]] %s2258_s0 }
   0x2   :  { %2285 = sst [smem:[#allocation34_spill]] %s2259_s1 }
   0x3   :  { %2286 = sst [smem:[#allocation35_spill]] %s2261_s3 }
   0x4   :  { %2287 = sst [smem:[#allocation36_spill]] %s2263_s5 }
   0x5   :  { %2288 = sst [smem:[#allocation37_spill]] %s2265_s7 }
   0x6   :  { %2289 = sst [smem:[#allocation38_spill]] %s2267_s9 }
   0x7   :  { %2290 = sst [smem:[#allocation39_spill]] %s2268_s10 }
   0x8   :  { %2291 = sst [smem:[#allocation40_spill]] %s2269_s11 }
   0x9   :  { %2292 = sst [smem:[#allocation41_spill]] %s2270_s12 }
   0xa   :  { %18 = vsyncpa [#allocation7], 0 }
   0xb   :  { %20 = vsyncpa [#allocation7 + $0x1], 0 }
   0xc   :  { %21 = vsyncpa [#allocation10], 0 }
   0xd   :  { %23 = vsyncpa [#allocation10 + $0x1], 0 }
   0xe   :  { %24 = vsyncpa [#allocation13], 0 }
   0xf   :  { %25 = vsyncpa [#allocation16], 0 }
  0x10   :  { %26 = vsyncpa [#allocation8], 0 }
  0x11   :  { %28 = vsyncpa [#allocation8 + $0x1], 0 }
  0x12   :  { %29 = vsyncpa [#allocation20], 0 }
  0x13   :  { %31 = vsyncpa [#allocation20 + $0x1], 0  ;;  %s1944_s21 = smov 0   ;;  %s1946_s22 = smov 0  }
  0x14   :  { %s1948_s23 = smov 0   ;;  %s1950_s24 = smov 0  }
  0x15   :  { %s1952_s25 = smov 0   ;;  %s1954_s26 = smov 0  }
  0x16 LB: > { %2293 = sst [smem:[#allocation27_spill]] %s1843_s21  ;;  %s1975_s27 = sadd.s32 4294967295, %s1863_s26   ;;  %s1863_s26 = sphi %s1954_s26, %s37_s26   ;;  %s1859_s25 = sphi %s1952_s25, %s2323_s25   ;;  %s1855_s24 = sphi %s1950_s24, %s2322_s24   ;;  %s1851_s23 = sphi %s1948_s23, %s2326_s23   ;;  %s1847_s22 = sphi %s1946_s22, %s2325_s22   ;;  %s1843_s21 = sphi %s1944_s21, %s2324_s21  }
  0x17   : > { %2294 = sst [smem:[#allocation28_spill]] %s1859_s25  ;;  %p1297_p0 = scmp.ge.s32.totalorder %s1863_s26, 1 }
  0x18   : > { %2295 = sst [smem:[#allocation29_spill]] %s1863_s26  ;;  %p72_p1 = scmp.eq.s32.totalorder %s1975_s27, 0 }
  0x19   : > { %p358_p2 = scmp.lt.s32.totalorder %s1863_s26, 3  ;;  %s2296_s3 = sld [smem:[#allocation35_spill]] }
  0x1a   : > { %s1865_s14 = smov [#allocation12]   ;;  %p1302_p6 = scmp.ge.s32.totalorder %s1863_s26, 2 }
  0x1b   : > { %p1983_p3 = pnand %p1297_p0, %p358_p2  ;;  %s371_s15 = sshll.u32 %s1865_s14, 4  ;;  %s372_s15 = int_to_ptr.vmem [resolvable:$true] %s371_s15 }
  0x1c   : > { %s2299_s7 = sld [smem:[#allocation37_spill]]  ;;  %s2271_s20 = smov 64  }
  0x1d   : > { %p1405_p4 = pneg %p1983_p3  ;;  %s2273_s28 = smov 4  }
  0x1e   : > { %s1868_s29 = smov [#allocation15]   ;;  %s1296_s17 = sadd.s32 4294967294, %s1863_s26  }
  0x1f   : > { %s369_s30 = sshll.u32 %s2296_s3, 4  ;;  %p1991_p5 = pnand %p1405_p4, %p72_p1  ;;  %s370_s30 = int_to_ptr.hbm [resolvable:$true] %s369_s30 }
  0x20   : > { %s405_s14 = sshll.u32 %s1868_s29, 4  ;;  %s49_s18 = sadd.s32 1, %s1859_s25  ;;  %s406_s14 = int_to_ptr.vmem [resolvable:$true] %s405_s14 }
  0x21   : > { %1408 = dma.hbm_to_vmem [thread:$0]  (!%p1991_p5), %s370_s30, 256, %s372_s15, [#allocation13], %s2271_s20, %s2271_s20, %s2273_s28  }
  0x22   : > { %s403_s19 = sshll.u32 %s2299_s7, 4  ;;  %p51_p7 = scmp.ge.s32.totalorder %s49_s18, 2  ;;  %s404_s19 = int_to_ptr.hbm [resolvable:$true] %s403_s19 }
  0x23   : > { %1414 = dma.hbm_to_vmem [thread:$0]  (!%p1991_p5), %s404_s19, 256, %s406_s14, [#allocation16], %s2271_s20, %s2271_s20, %s2273_s28  }
  0x24   : > { %s58_s3 = sadd.s32 1, %s1851_s23  ;;  %p65_p8 = scmp.ne.s32.totalorder %s1851_s23, %s1847_s22 }
  0x25   : > { %p66_p9 = scmp.eq.s32.totalorder %s1863_s26, 0  ;;  %s2328_s18 = smov (%p51_p7, %s49_s18), 0 }
  0x26   : > { %2300 = sst [smem:[#allocation30_spill]] %s2328_s18  ;;  %p71_p11 = scmp.ne.s32.totalorder %s1847_s22, %s1843_s21 }
  0x27   : > { %p2017_p10 = por %p66_p9, %p65_p8  ;;  %s53_s15 = ssub.s32 %s1859_s25, %s2328_s18 }
  0x28   : > { %p317_p12 = scmp.eq.s32.totalorder %s1975_s27, 1  ;;  %p56_p13 = scmp.eq.s32.totalorder %s53_s15, 0 }
  0x29   : > { %p2028_p0 = por %p72_p1, %p71_p11  ;;  %p323_p4 = scmp.eq.s32.totalorder %s1296_s17, 1 }
  0x2a   : > { %p2032_p2 = por %p317_p12, %p65_p8  ;;  %p1439_p9 = scmp.lt.s32.totalorder %s1863_s26, 2 }
  0x2b   : > { %s2037_s14 = scalar_select %p56_p13, %s1851_s23, %s58_s3  }
  0x2c   : > { %p2039_p7 = por %p323_p4, %p71_p11  ;;  %s2279_s28 = sand.u32 1, %s1851_s23  }
  0x2d   : > { %2304 = sst [smem:[#allocation31_spill]] %s2037_s14  ;;  %s2046_s7 = sshll.u32 %s1859_s25, 3 }
  0x2e   : > { %s2305_s20 = scalar_select %p2039_p7, 1, 0 }
  0x2f   : > { %s2050_s15 = sshll.u32 %s2279_s28, 3  ;;  %p2054_p8 = pnand %p1439_p9, %p2017_p10 }
  0x30   : > { %2306 = sst [smem:[#allocation32_spill]] %s2305_s20  ;;  %s459_s3 = sand.u32 1, %s1863_s26  }
  0x31   : > { %s2308_s1 = sld [smem:[#allocation34_spill]]  ;;  %s463_s21 = scalar_lea.vmem [#allocation9], %s2050_s15 }
  0x32   : > { %s471_s25 = sshll.u32 %s463_s21, 4  ;;  %s2309_s5 = sld [smem:[#allocation36_spill]]  ;;  %s472_s25 = int_to_ptr.vmem [resolvable:$true] %s471_s25 }
  0x33   : > { %s460_s12 = scalar_lea.sflag [#allocation10], %s459_s3  ;;  %s1869_s26 = smov [#allocation14]  }
  0x34   : > { %s388_s14 = sshll.u32 %s1869_s26, 4  ;;  %s2310_s9 = sld [smem:[#allocation38_spill]]  ;;  %s389_s14 = int_to_ptr.vmem [resolvable:$true] %s388_s14 }
  0x35   : > { %s2312_s28 = smov 64   ;;  %s1870_s3 = smov [#allocation17]  }
  0x36   : > { %s2313_s0 = sld [smem:[#allocation33_spill]]  ;;  %s443_s17 = scalar_lea.vmem [#allocation6], %s2050_s15 }
  0x37   : > { %s467_s20 = scalar_lea.hbm %s2308_s1, %s2046_s7 }
  0x38   : > { %s469_s10 = sshll.u32 %s467_s20, 4  ;;  %s386_s11 = sshll.u32 %s2309_s5, 4  ;;  %s470_s10 = int_to_ptr.hbm [resolvable:$true] %s469_s10  ;;  %s387_s11 = int_to_ptr.hbm [resolvable:$true] %s386_s11 }
  0x39   : > { %1424 = dma.hbm_to_vmem [thread:$0]  (!%p2054_p8), %s470_s10, 128, %s472_s25, %s460_s12  }
  0x3a   : > { %s420_s21 = sshll.u32 %s2310_s9, 4  ;;  %s2311_s20 = smov 4   ;;  %s421_s21 = int_to_ptr.hbm [resolvable:$true] %s420_s21 }
  0x3b   : > { %1411 = dma.hbm_to_vmem [thread:$0]  (!%p1991_p5), %s387_s11, 256, %s389_s14, [#allocation13], %s2312_s28, %s2312_s28, %s2311_s20  }
  0x3c   : > { %s422_s10 = sshll.u32 %s1870_s3, 4  ;;  %s448_s26 = scalar_lea.hbm %s2313_s0, %s2046_s7  ;;  %s423_s10 = int_to_ptr.vmem [resolvable:$true] %s422_s10 }
  0x3d   : > { %1417 = dma.hbm_to_vmem [thread:$0]  (!%p1991_p5), %s421_s21, 256, %s423_s10, [#allocation16], %s2312_s28, %s2312_s28, %s2311_s20  }
  0x3e   : > { %s450_s1 = sshll.u32 %s448_s26, 4  ;;  %s452_s5 = sshll.u32 %s443_s17, 4  ;;  %s451_s1 = int_to_ptr.hbm [resolvable:$true] %s450_s1  ;;  %s453_s5 = int_to_ptr.vmem [resolvable:$true] %s452_s5 }
  0x3f   : > { %s2314_s9 = sand.u32 1, %s1851_s23   ;;  %s486_s25 = scalar_lea.hbm %s2260_s2, %s2046_s7 }
  0x40   : > { %s440_s11 = scalar_lea.sflag [#allocation7], %s2314_s9  ;;  %s488_s30 = sshll.u32 %s486_s25, 4  ;;  %s489_s30 = int_to_ptr.hbm [resolvable:$true] %s488_s30 }
  0x41   : > { %1421 = dma.hbm_to_vmem [thread:$0]  (!%p2054_p8), %s451_s1, 128, %s453_s5, %s440_s11  }
  0x42   : > { %s482_s0 = scalar_lea.vmem [#allocation11], %s2050_s15  ;;  %499 = sbr.rel (%p1983_p3) target bundleno = 1162 (0x48a), region = 64 }
  0x43   : > { %s490_s16 = sshll.u32 %s482_s0, 4  ;;  %s2101_s21 = sand.u32 (!%p1983_p3), 1, %s1847_s22   ;;  %s491_s16 = int_to_ptr.vmem [resolvable:$true] %s490_s16 }
  0x44   : > { %1427 = dma.hbm_to_vmem [thread:$0]  (!%p2054_p8), %s489_s30, 128, %s491_s16, %s460_s12  }
  0x45   : > { %s2104_s5 = sshll.u32 (!%p1983_p3), %s2101_s21, 3  ;;  %s502_s7 = scalar_lea.sflag (!%p1983_p3), [#allocation7], %s2101_s21 }
  0x46   : > { %s505_s9 = scalar_lea.vmem (!%p1983_p3), [#allocation6], %s2104_s5 }
  0x47   : > { %1818 = dma.done.wait (%p2028_p0), %s502_s7, 128  }
  0x48   : > { %1820 = vsyncadd (%p2028_p0), %s502_s7, 4294967168  ;;  %s511_s0 = sand.u32 1, %s1975_s27   ;;  %s515_s13 = scalar_lea.vmem [#allocation9], %s2104_s5 }
  0x49   : > { %s512_s12 = scalar_lea.sflag [#allocation10], %s511_s0 }
  0x4a   : > { %1822 = dma.done.wait (%p2028_p0), %s512_s12, 256  }
  0x4b   : > { %1824 = vsyncadd (%p2028_p0), %s512_s12, 4294967040  ;;  %s525_s18 = scalar_lea.vmem [#allocation11], %s2104_s5 }
  0x4c   : > { %1826 = dma.done.wait (%p72_p1), [#allocation13], 512  }
  0x4d   : > { %1828 = vsyncadd (%p72_p1), [#allocation13], 4294966784 }
  0x4e   : > { %1830 = dma.done.wait (%p72_p1), [#allocation16], 512  }
  0x4f   : > { %1832 = vsyncadd (%p72_p1), [#allocation16], 4294966784  ;;  %v1371_v0 = vld [vmem:[#allocation14 + $0x8] sm:$0xff]  ;;  %v1375_v1 = vld [vmem:[#allocation12 + $0x8] sm:$0xff]  ;;  %vm631_vm0 = vcmask 261120   ;;  %vm686_vm1 = vcmask 60416  }
  0x50   : > { %v1370_v2 = vld [vmem:[#allocation14] sm:$0xff]  ;;  %v1374_v3 = vld [vmem:[#allocation12] sm:$0xff]  ;;  %641 = vmatpush.bf16.msra.mxu0 %v1371_v0  ;;  %753 = vmatpush.bf16.msra.mxu2 %v1375_v1  ;;  %v1507_v8 = vld [vmem:[%s2264_s6] ss:$0 sm:$0xff]  ;;  %s1871_s28 = smov 120   ;;  %s1872_s10 = smov 104  }
  0x51   : > { %v607_v4 = vld [vmem:[%s515_s13] sm:$0xff]  ;;  %v721_v5 = vld [vmem:[%s505_s9] sm:$0xff]  ;;  %vm792_vm2 = vcmask 64512   ;;  %s1873_s26 = smov 112   ;;  %vm924_vm3 = vcmask 1043456   ;;  %s1318_s11 = sshll.u32 %s2101_s21, 4 }
  0x52   : > { %v608_v6 = vpack.c.bf16 %v607_v4, %v607_v4  ;;  %v722_v7 = vpack.c.bf16 %v721_v5, %v721_v5  ;;  %v1508_v12 = vld [vmem:[%s2262_s4] ss:$0 sm:$0xff]  ;;  %v1373_v22 = vld [vmem:[#allocation15 + $0x8] sm:$0xff]  ;;  %v1372_v23 = vld [vmem:[#allocation15] sm:$0xff]  ;;  %s2181_s14 = scalar_lea.vmem [#allocation19], %s1318_s11  ;;  %s1874_s3 = smov 8  }
  0x53   : > { %678 = vmatpush.bf16.msra.mxu1 %v1373_v22  ;;  %v609_v24 = vld [vmem:[%s525_s18] sm:$0xff]  ;;  %s1875_s25 = smov 16   ;;  %s1876_s30 = smov 24   ;;  %vm1007_vm4 = vcmask 126016   ;;  %vm1013_vm5 = vcmask 191616   ;;  %vm1019_vm6 = vcmask 257216  }
  0x54   : > { %642 = vmatpush.bf16.msra.mxu0 %v1370_v2  ;;  %754 = vmatpush.bf16.msra.mxu2 %v1374_v3  ;;  %v610_v25 = vpack.c.bf16 %v609_v24, %v609_v24  ;;  %v1509_v43 = vld [vmem:[%s2266_s8] ss:$0 sm:$0xff]  ;;  %s1378_s16 = sshll.u32 %s1855_s24, 4  ;;  %s2315_s0 = sld [smem:[#allocation41_spill]] }
  0x55   : > { %s1093_s13 = sshll.u32 %s2181_s14, 4  ;;  %s1065_s19 = scalar_lea.sflag [#allocation20], %s2101_s21  ;;  %s1094_s13 = int_to_ptr.vmem [resolvable:$true] %s1093_s13 }
  0x57   : > { %1327 = vmatmul.msk.bf16.vlgmr.msra.gmra.mxu0 %vm631_vm0, %v608_v6  ;;  %1345 = vmatmul.msk.bf16.vlgmr.msra.gmra.mxu2 %vm631_vm0, %v722_v7 }
  0x58   : > { %679 = vmatpush.bf16.msra.mxu1 %v1372_v23 }
  0x5a   : > { %s1092_s12 = scalar_lea.hbm %s2315_s0, %s1378_s16 }
  0x5b   : > { %1336 = vmatmul.msk.bf16.vlgmr.msra.gmra.mxu1 %vm631_vm0, %v610_v25  ;;  %s1095_s18 = sshll.u32 %s1092_s12, 4  ;;  %s1096_s18 = int_to_ptr.hbm [resolvable:$true] %s1095_s18 }
  0x5c   : > { %s1751_s27 = sshra.s32 %s1096_s18, 4  ;;  %s1752_s27 = int_to_ptr.hbm [resolvable:$true] %s1751_s27 }
  0x5d   : > { %s1753_s15 = scalar_lea.hbm %s1752_s27, 16  ;;  %p1758_p10 = scmp.lt.s32.totalorder %s1752_s27, %s2315_s0 }
  0x5e   : > { %p1754_p1 = scmp.ne.s32.totalorder %s1752_s27, %s1753_s15 }
  0x60   : > { %p1755_p3 = pnand %p1754_p1, %p2032_p2 }
  0x62   : > { %p1756_p5 = pneg %p1755_p3 }
  0xd4   : > { %v644_v9 = vpop.f32.mrf.mxu0 }
  0xd5   : > { %v645_v10 = vadd.f32 %v1507_v8, %v644_v9 }
  0xd7   : > { %v648_v11 = vpack.c.bf16 %v645_v10, %v645_v10 }
  0xd8   : > { %v681_v44 = vpop.f32.mrf.mxu1 }
  0xd9   : > { %687 = vst.msk [vmem:[#allocation3] sm:$0xf] %vm686_vm1, %v648_v11  ;;  %690 = vrot.lane.b32.xlu1 %v648_v11, %s1871_s28  ;;  %711 = vrot.lane.b32.xlu0 %v648_v11, %s1872_s10  ;;  %v682_v45 = vadd.f32 %v1509_v43, %v681_v44 }
  0xda   : > { %v756_v13 = vpop.f32.mrf.mxu2 }
  0xdb   : > { %v757_v14 = vadd.f32 %v1508_v12, %v756_v13  ;;  %v685_v46 = vpack.c.bf16 %v682_v45, %v682_v45 }
  0xdc   : > { %v646_v15 = vpop.f32.mrf.mxu0 }
  0xdd   : > { %v760_v16 = vmul.f32 0.35355338, %v757_v14  ;;  %688 = vst.msk [vmem:[#allocation4] sm:$0xf] %vm686_vm1, %v685_v46 }
  0xdf   : > { %v761_v17 = vpack.c.bf16 %v760_v16, %v760_v16 }
  0xe0   : > { %v784_v18 = vld [vmem:[#allocation3] sm:$0xf]  ;;  %v683_v47 = vpop.f32.mrf.mxu1 }
  0xe1   : > { %763 = vst.msk [vmem:[#allocation2] sm:$0xf] %vm686_vm1, %v761_v17  ;;  %765 = vrot.lane.b32.xlu2 %v761_v17, %s1871_s28  ;;  %701 = vrot.lane.b32.xlu1 %v648_v11, %s1873_s26  ;;  %v797_v19 = vsel %vm792_vm2, %v784_v18, 0 }
  0xe2   : > { %775 = vrot.lane.b32.xlu0 %v761_v17, %s1872_s10  ;;  %v758_v20 = vpop.f32.mrf.mxu2  ;;  %806 = vmatpush.bf16.xpose.msra.mxu3 %v797_v19 }
  0xe4   : > { %v788_v48 = vld [vmem:[#allocation4] sm:$0xf] }
  0xe5   : > { %v926_v49 = vsel %vm924_vm3, %v788_v48, 0 }
  0xe8   : > { %v780_v21 = vld [vmem:[#allocation2] sm:$0xf] }
  0xe9   : > { %770 = vrot.lane.b32.xlu2 %v761_v17, %s1873_s26  ;;  %1346 = vmatmul.msk.bf16.vlgmr.msra.gmra.mxu3 %vm792_vm2, %v780_v21 }
  0xea   : > { %935 = vmatpush.bf16.msrb.mxu3 %v926_v49 }
 0x13b   : > { %v766_v26 = vpop.permute.xlu2 %765 }
 0x13c   : > { %769 = vst.msk [vmem:[#allocation2 + $0x4] sm:$0xf] %vm686_vm1, %v766_v26 }
 0x143   : > { %v771_v27 = vpop.permute.xlu2 %770  ;;  %v781_v36 = vld [vmem:[#allocation2 + $0x4] sm:$0xf] }
 0x144   : > { %774 = vst.msk [vmem:[#allocation2 + $0x8] sm:$0xf] %vm686_vm1, %v771_v27 }
 0x14b   : > { %v691_v28 = vpop.permute.xlu1 %690  ;;  %v712_v29 = vpop.permute.xlu0 %711  ;;  %v782_v40 = vld [vmem:[#allocation2 + $0x8] sm:$0xf] }
 0x14c   : > { %694 = vst.msk [vmem:[#allocation3 + $0x4] sm:$0xf] %vm686_vm1, %v691_v28 }
 0x14d   : > { %715 = vst.msk [vmem:[#allocation3 + $0xc] sm:$0xf] %vm686_vm1, %v712_v29 }
 0x153   : > { %v702_v30 = vpop.permute.xlu1 %701  ;;  %v785_v31 = vld [vmem:[#allocation3 + $0x4] sm:$0xf] }
 0x154   : > { %705 = vst.msk [vmem:[#allocation3 + $0x8] sm:$0xf] %vm686_vm1, %v702_v30  ;;  %v776_v32 = vpop.permute.xlu0 %775  ;;  %v816_v33 = vsel %vm792_vm2, %v785_v31, 0  ;;  %v787_v34 = vld [vmem:[#allocation3 + $0xc] sm:$0xf] }
 0x155   : > { %779 = vst.msk [vmem:[#allocation2 + $0xc] sm:$0xf] %vm686_vm1, %v776_v32  ;;  %825 = vmatpush.bf16.xpose.msrb.mxu0 %v816_v33  ;;  %v854_v35 = vsel %vm792_vm2, %v787_v34, 0 }
 0x156   : > { %863 = vmatpush.bf16.xpose.msrb.mxu2 %v854_v35 }
 0x15b   : > { %v786_v37 = vld [vmem:[#allocation3 + $0x8] sm:$0xf] }
 0x15c   : > { %1347 = vmatmul.msk.bf16.vlgmr.msrb.gmra.mxu0 %vm792_vm2, %v781_v36  ;;  %v783_v38 = vld [vmem:[#allocation2 + $0xc] sm:$0xf]  ;;  %v835_v39 = vsel %vm792_vm2, %v786_v37, 0 }
 0x15d   : > { %1349 = vmatmul.msk.bf16.vlgmr.msrb.gmra.mxu2 %vm792_vm2, %v783_v38  ;;  %844 = vmatpush.bf16.xpose.msrb.mxu1 %v835_v39 }
 0x164   : > { %1348 = vmatmul.msk.bf16.vlgmr.msrb.gmra.mxu1 %vm792_vm2, %v782_v40 }
 0x16c   : > { %v808_v41 = vpop.f32.mrf.mxu3 }
 0x16d   : > { %v869_v59 = vsel %vm792_vm2, %v808_v41, -inf }
 0x174   : > { %v810_v42 = vpop.f32.mrf.mxu3 }
 0x1d9   : > { %v827_v50 = vpop.f32.mrf.mxu0 }
 0x1da   : > { %v872_v51 = vsel %vm792_vm2, %v827_v50, -inf }
 0x1db   : > { %873 = vmax.xlane.f32.xlu1 %v872_v51 }
 0x1e0   : > { %v865_v52 = vpop.f32.mrf.mxu2 }
 0x1e1   : > { %v829_v53 = vpop.f32.mrf.mxu0  ;;  %v846_v54 = vpop.f32.mrf.mxu1  ;;  %v878_v55 = vsel %vm792_vm2, %v865_v52, -inf }
 0x1e2   : > { %879 = vmax.xlane.f32.xlu0 %v878_v55  ;;  %v875_v56 = vsel %vm792_vm2, %v846_v54, -inf  ;;  %v1376_v55 = vld [vmem:[#allocation17] sm:$0xff] }
 0x1e3   : > { %876 = vmax.xlane.f32.xlu2 %v875_v56 }
 0x1e8   : > { %v867_v57 = vpop.f32.mrf.mxu2 }
 0x1e9   : > { %v848_v58 = vpop.f32.mrf.mxu1 }
 0x1eb   : > { %870 = vmax.xlane.f32.xlu2 %v869_v59 }
 0x1f6   : > { %716 = vrot.lane.b32.xlu0 %v685_v46, %s1872_s10  ;;  %s1757_s10 = scalar_lea.hbm %s2315_s0, 32 }
 0x1f7   : > { %p1759_p11 = scmp.lt.s32.totalorder %s1757_s10, %s1753_s15 }
 0x1f9   : > { %p1760_p12 = por %p1759_p11, %p1758_p10 }
 0x1fb   : > { %p1761_p13 = pnand %p1760_p12, %p1756_p5 }
 0x203   : > { %696 = vrot.lane.b32.xlu2 %v685_v46, %s1871_s28 }
 0x24e   : > { %v874_v60 = vpop.xlane.xlu1 %873 }
 0x24f   : > { %v882_v61 = vsub.f32 %v827_v50, %v874_v60 }
 0x251   : > { %v887_v62 = vmul.f32 1.442695, %v882_v61 }
 0x253   : > { %1511 = vpow2.f32 %v887_v62 }
 0x255   : > { %v880_v63 = vpop.xlane.xlu0 %879 }
 0x256   : > { %v884_v0 = vsub.f32 %v865_v52, %v880_v63  ;;  %v877_v1 = vpop.xlane.xlu2 %876 }
 0x257   : > { %v883_v2 = vsub.f32 %v846_v54, %v877_v1  ;;  %v1377_v54 = vld [vmem:[#allocation17 + $0x8] sm:$0xff] }
 0x258   : > { %v891_v3 = vmul.f32 1.442695, %v884_v0  ;;  %1051 = vmatpush.bf16.msra.mxu3 %v1377_v54 }
 0x259   : > { %v1512_v4 = vpop.eup %1511  ;;  %v889_v5 = vmul.f32 1.442695, %v883_v2 }
 0x25a   : > { %1513 = vpow2.f32 %v891_v3  ;;  %v896_v6 = vsel %vm792_vm2, %v1512_v4, 0.0 }
 0x25b   : > { %1515 = vpow2.f32 %v889_v5  ;;  %897 = vadd.xlane.f32.xlu1 %v896_v6 }
 0x25c   : > { %1052 = vmatpush.bf16.msra.mxu3 %v1376_v55 }
 0x25e   : > { %v871_v7 = vpop.xlane.xlu2 %870 }
 0x25f   : > { %v881_v8 = vsub.f32 %v808_v41, %v871_v7 }
 0x260   : > { %v1514_v9 = vpop.eup %1513 }
 0x261   : > { %v1516_v10 = vpop.eup %1515  ;;  %v885_v11 = vmul.f32 1.442695, %v881_v8  ;;  %v902_v13 = vsel %vm792_vm2, %v1514_v9, 0.0 }
 0x262   : > { %v899_v12 = vsel %vm792_vm2, %v1516_v10, 0.0 }
 0x263   : > { %1517 = vpow2.f32 %v885_v11  ;;  %900 = vadd.xlane.f32.xlu0 %v899_v12  ;;  %903 = vadd.xlane.f32.xlu1 %v902_v13 }
 0x266   : > { %v697_v14 = vpop.permute.xlu2 %696 }
 0x267   : > { %700 = vst.msk [vmem:[#allocation4 + $0x4] sm:$0xf] %vm686_vm1, %v697_v14 }
 0x268   : > { %v717_v15 = vpop.permute.xlu0 %716 }
 0x269   : > { %v1518_v16 = vpop.eup %1517  ;;  %720 = vst.msk [vmem:[#allocation4 + $0xc] sm:$0xf] %vm686_vm1, %v717_v15 }
 0x26a   : > { %v893_v17 = vsel %vm792_vm2, %v1518_v16, 0.0 }
 0x26b   : > { %894 = vadd.xlane.f32.xlu2 %v893_v17 }
 0x26e   : > { %v789_v18 = vld [vmem:[#allocation4 + $0x4] sm:$0xf] }
 0x26f   : > { %v945_v19 = vsel %vm924_vm3, %v789_v18, 0 }
 0x270   : > { %954 = vmatpush.bf16.msra.mxu0 %v945_v19  ;;  %v791_v20 = vld [vmem:[#allocation4 + $0xc] sm:$0xf] }
 0x271   : > { %v983_v21 = vsel %vm924_vm3, %v791_v20, 0 }
 0x272   : > { %992 = vmatpush.bf16.msra.mxu2 %v983_v21 }
 0x27c   : > { %706 = vrot.lane.b32.xlu1 %v685_v46, %s1873_s26 }
 0x2ce   : > { %v898_v22 = vpop.xlane.xlu1 %897 }
 0x2cf   : > { %1519 = vrcp.f32 %v898_v22 }
 0x2d5   : > { %v1520_v23 = vpop.eup %1519 }
 0x2d6   : > { %v910_v24 = vmul.f32 %v1520_v23, %v1512_v4  ;;  %v904_v25 = vpop.xlane.xlu1 %903  ;;  %v901_v26 = vpop.xlane.xlu0 %900 }
 0x2d7   : > { %1521 = vrcp.f32 %v904_v25 }
 0x2d8   : > { %v914_v27 = vpack.c.bf16 %v910_v24, %v910_v24  ;;  %1523 = vrcp.f32 %v901_v26 }
 0x2da   : > { %918 = vst.msk [vmem:[%s2181_s14 + $0x4] sm:$0xf] %vm686_vm1, %v914_v27  ;;  %1351 = vmatmul.msk.bf16.vlgmr.msra.gmra.mxu0 %vm792_vm2, %v914_v27 }
 0x2dd   : > { %v1522_v28 = vpop.eup %1521 }
 0x2de   : > { %v1524_v29 = vpop.eup %1523  ;;  %v912_v30 = vmul.f32 %v1522_v28, %v1514_v9  ;;  %v895_v31 = vpop.xlane.xlu2 %894 }
 0x2df   : > { %v911_v32 = vmul.f32 %v1524_v29, %v1516_v10  ;;  %1525 = vrcp.f32 %v895_v31 }
 0x2e0   : > { %v916_v33 = vpack.c.bf16 %v912_v30, %v912_v30 }
 0x2e1   : > { %v915_v34 = vpack.c.bf16 %v911_v32, %v911_v32 }
 0x2e2   : > { %920 = vst.msk [vmem:[%s2181_s14 + $0xc] sm:$0xf] %vm686_vm1, %v916_v33  ;;  %1353 = vmatmul.msk.bf16.vlgmr.msra.gmra.mxu2 %vm792_vm2, %v916_v33 }
 0x2e3   : > { %919 = vst.msk [vmem:[%s2181_s14 + $0x8] sm:$0xf] %vm686_vm1, %v915_v34 }
 0x2e5   : > { %v1526_v35 = vpop.eup %1525 }
 0x2e6   : > { %v909_v36 = vmul.f32 %v1526_v35, %v1518_v16 }
 0x2e8   : > { %v913_v37 = vpack.c.bf16 %v909_v36, %v909_v36 }
 0x2ea   : > { %917 = vst.msk [vmem:[%s2181_s14] sm:$0xf] %vm686_vm1, %v913_v37  ;;  %1350 = vmatmul.msk.bf16.vlgmr.msrb.gmra.mxu3 %vm792_vm2, %v913_v37 }
 0x2ee   : > { %v707_v38 = vpop.permute.xlu1 %706 }
 0x2ef   : > { %710 = vst.msk [vmem:[#allocation4 + $0x8] sm:$0xf] %vm686_vm1, %v707_v38 }
 0x2f6   : > { %v790_v39 = vld [vmem:[#allocation4 + $0x8] sm:$0xf] }
 0x2f7   : > { %v964_v40 = vsel %vm924_vm3, %v790_v39, 0 }
 0x2f8   : > { %973 = vmatpush.bf16.msra.mxu1 %v964_v40 }
 0x2fb   : > { %1352 = vmatmul.msk.bf16.vlgmr.msra.gmra.mxu1 %vm792_vm2, %v915_v34 }
 0x357   : > { %v956_v41 = vpop.f32.mrf.mxu0 }
 0x358   : > { %v999_v42 = vpack.c.bf16 %v956_v41, %v956_v41 }
 0x35a   : > { %1004 = vrot.lane.b32.xlu1 %v999_v42, %s1874_s3 }
 0x35f   : > { %v958_v43 = vpop.f32.mrf.mxu0 }
 0x365   : > { %v994_v44 = vpop.f32.mrf.mxu2 }
 0x366   : > { %v1001_v52 = vpack.c.bf16 %v994_v44, %v994_v44 }
 0x36d   : > { %v937_v45 = vpop.f32.mrf.mxu3  ;;  %v996_v46 = vpop.f32.mrf.mxu2 }
 0x36e   : > { %v998_v47 = vpack.c.bf16 %v937_v45, %v937_v45 }
 0x370   : > { %1002 = vst.msk [vmem:[#allocation5] sm:$0xf] %vm686_vm1, %v998_v47 }
 0x375   : > { %v939_v48 = vpop.f32.mrf.mxu3 }
 0x378   : > { %v975_v49 = vpop.f32.mrf.mxu1 }
 0x379   : > { %v1000_v50 = vpack.c.bf16 %v975_v49, %v975_v49 }
 0x37b   : > { %1010 = vrot.lane.b32.xlu1 %v1000_v50, %s1875_s25 }
 0x380   : > { %v977_v51 = vpop.f32.mrf.mxu1 }
 0x383   : > { %1016 = vrot.lane.b32.xlu1 %v1001_v52, %s1876_s30 }
 0x3cc   : > { %v1005_v53 = vpop.permute.xlu1 %1004 }
 0x3cd   : > { %1008 = vst.msk [vmem:[#allocation5] sm:$0xf] %vm1007_vm4, %v1005_v53 }
 0x3ed   : > { %v1011_v56 = vpop.permute.xlu1 %1010 }
 0x3ee   : > { %1014 = vst.msk [vmem:[#allocation5] sm:$0xf] %vm1013_vm5, %v1011_v56 }
 0x3f5   : > { %v1017_v57 = vpop.permute.xlu1 %1016 }
 0x3f6   : > { %1020 = vst.msk [vmem:[#allocation5] sm:$0xf] %vm1019_vm6, %v1017_v57 }
 0x3fd   : > { %v1021_v58 = vld [vmem:[#allocation5] sm:$0xf] }
 0x3fe   : > { %1362 = vmatmul.msk.bf16.vlgmr.msra.gmra.mxu3 %vm631_vm0, %v1021_v58 }
 0x3ff   : > { %1764 = shalt.err (!%p1761_p13)
}
 0x400   : > { %s1877_s17 = smov 64   ;;  %s1878_s11 = smov 4  }
 0x401   : > { %1402 = dma.vmem_to_hbm [thread:$0]  (%p2032_p2), %s1094_s13, 256, %s1096_s18, %s1065_s19, %s1877_s17, %s1877_s17, %s1878_s11  }
 0x402   : > { %s1365_s14 = sshll.u32 %s1855_s24, 3  ;;  %s2316_s30 = sld [smem:[#allocation40_spill]] }
 0x403   : > { %s2317_s12 = sld [smem:[#allocation39_spill]]  ;;  %s594_s27 = scalar_lea.vmem [#allocation18], %s2104_s5 }
 0x404   : > { %s1078_s15 = sshll.u32 %s594_s27, 4  ;;  %s1060_s13 = scalar_lea.sflag [#allocation8], %s2101_s21  ;;  %s1079_s15 = int_to_ptr.vmem [resolvable:$true] %s1078_s15 }
 0x408   : > { %s1076_s16 = scalar_lea.hbm %s2316_s30, %s1365_s14  ;;  %s1785_s5 = scalar_lea.hbm %s2316_s30, 16 }
 0x409   : > { %v1510_v59 = vld [vmem:[%s2317_s12] ss:$0 sm:$0xff]  ;;  %s1080_s20 = sshll.u32 %s1076_s16, 4  ;;  %s1081_s20 = int_to_ptr.hbm [resolvable:$true] %s1080_s20 }
 0x40a   : > { %s1779_s24 = sshra.s32 %s1081_s20, 4  ;;  %s1780_s24 = int_to_ptr.hbm [resolvable:$true] %s1779_s24 }
 0x40b   : > { %s1781_s18 = scalar_lea.hbm %s1780_s24, 8  ;;  %p1786_p8 = scmp.lt.s32.totalorder %s1780_s24, %s2316_s30 }
 0x40c   : > { %p1782_p0 = scmp.ne.s32.totalorder %s1780_s24, %s1781_s18  ;;  %p1787_p1 = scmp.lt.s32.totalorder %s1785_s5, %s1781_s18 }
 0x40e   : > { %p1783_p4 = pnand %p1782_p0, %p2032_p2  ;;  %p1788_p3 = por %p1787_p1, %p1786_p8 }
 0x410   : > { %p1784_p9 = pneg %p1783_p4 }
 0x412   : > { %p1789_p5 = pnand %p1788_p3, %p1784_p9 }
 0x481   : > { %v1054_v60 = vpop.f32.mrf.mxu3 }
 0x482   : > { %v1055_v61 = vadd.f32 %v1510_v59, %v1054_v60 }
 0x484   : > { %1058 = vst.msk [vmem:[%s594_s27] sm:$0xff] %vm631_vm0, %v1055_v61 }
 0x485   : > { %1792 = shalt.err (!%p1789_p5)
}
 0x486   : > { %1401 = dma.vmem_to_hbm [thread:$0]  (%p2032_p2), %s1079_s15, 128, %s1081_s20, %s1060_s13  }
 0x489   : > { %v1056_v62 = vpop.f32.mrf.mxu3 }
 0x48a PF: > { %s2318_s21 = sld [smem:[#allocation27_spill]]  ;;  %p1429_p10 = pnand %p1302_p6, %p2039_p7 }
 0x48b   : > { %s2320_s17 = sld [smem:[#allocation29_spill]] }
 0x48c   : > { %p1430_p11 = pneg %p1429_p10 }
 0x490   : > { %s1110_s11 = sand.u32 1, %s2318_s21  }
 0x491   : > { %s1111_s14 = scalar_lea.sflag [#allocation8], %s1110_s11 }
 0x492   : > { %1834 = dma.done.wait (%p1430_p11), %s1111_s14, 128  }
 0x493   : > { %1836 = vsyncadd (%p1430_p11), %s1111_s14, 4294967168  ;;  %s1121_s3 = scalar_lea.sflag [#allocation20], %s1110_s11 }
 0x494   : > { %1838 = dma.done.wait (%p1430_p11), %s1121_s3, 256  }
 0x495   : > { %1840 = vsyncadd (%p1430_p11), %s1121_s3, 4294967040  ;;  %s37_s26 = sadd.s32 1, %s2320_s17   ;;  %s2321_s29 = sld [smem:[#allocation31_spill]] }
 0x496   : > { %p34_p12 = scmp.ge.s32.totalorder %s37_s26, 4   ;;  %s2322_s24 = sld [smem:[#allocation28_spill]] }
 0x497   : > { %s2323_s25 = sld [smem:[#allocation30_spill]]  ;;  %s2324_s21 = smov %s1847_s22 }
 0x498   : > { %s2325_s22 = smov %s1851_s23  ;;  %36 = sbr.rel (!%p34_p12) target bundleno = 22 (0x16), region = 179 }
 0x49b   : > { %s2326_s23 = smov %s2321_s29 }
 0x49d   :  { %1127 = vsyncpa [#allocation7], 1 }
 0x49e   :  { %1129 = vsyncpa [#allocation7 + $0x1], 1 }
 0x49f   :  { %1130 = vsyncpa [#allocation10], 1 }
 0x4a0   :  { %1132 = vsyncpa [#allocation10 + $0x1], 1 }
 0x4a1   :  { %1133 = vsyncpa [#allocation13], 1 }
 0x4a2   :  { %1134 = vsyncpa [#allocation16], 1 }
 0x4a3   :  { %1135 = vsyncpa [#allocation8], 1 }
 0x4a4   :  { %1137 = vsyncpa [#allocation8 + $0x1], 1 }
 0x4a5   :  { %1138 = vsyncpa [#allocation20], 1 }
 0x4a6   :  { %1140 = vsyncpa [#allocation20 + $0x1], 1 }

</bundles_post_ra>
